<compile_context>
chip_gen: v7x
topology: tpu7x:2x2x1
jax: 0.10.0
libtpu: 0.0.40
codegen_flags: <defaults>
</compile_context>

<pallas_src>
import functools

import jax
import jax.numpy as jnp
import numpy as np
from jax.experimental import pallas as pl
from jax.experimental.pallas import tpu as pltpu


# ---------------------------------------------------------------------------
# In-kernel helpers
# ---------------------------------------------------------------------------
def _split_indices(x, num_embeddings, num_buckets):
    """Remainder / quotient indices, both shifted +1 with 0 reserved for padding."""
    mask = (x != 0).astype(jnp.int32)
    # TODO(synk): if the bundle dump shows a long idiv sequence for the
    # non-power-of-two `% num_embeddings`, strength-reduce via magic multiply.
    xm = x % num_embeddings
    if num_buckets > 0 and (num_buckets & (num_buckets - 1)) == 0:
        # power-of-two bucket count -> single VPU bit ops instead of div/mod
        shift = int(num_buckets).bit_length() - 1
        rem = xm & (num_buckets - 1)
        quo = xm >> shift
    else:
        rem = xm % num_buckets
        quo = xm // num_buckets
    x_rem = (rem + 1) * mask
    x_quo = (quo + 1) * mask
    return x_rem, x_quo


def _qr_fused_kernel(x_ref, iota_ref, tab_ref, o_ref, *, num_embeddings,
                     num_buckets, v1, mul_combine):
    # x_ref   : (1, TN)        int32  lane-dense ids (tiled over the token grid)
    # iota_ref: (V1+V2, 1)     int32  resident row-index column
    # tab_ref : (rows, V1+V2)  f32    resident fused table (stacked or block-diag)
    # o_ref   : (out_d, TN)    f32    lane-dense output tile
    x = x_ref[...]
    x_rem, x_quo = _split_indices(x, num_embeddings, num_buckets)
    iota = iota_ref[...]                                     # (V1+V2, 1)
    # Single one-hot with two hits per column: row x_rem (< V1) and row V1+x_quo.
    onehot = ((iota == x_rem) | (iota == (x_quo + v1))).astype(jnp.float32)
    out = jnp.dot(tab_ref[...], onehot, preferred_element_type=jnp.float32)
    if mul_combine:
        d = out.shape[0] // 2
        o_ref[...] = out[:d] * out[d:]
    else:
        o_ref[...] = out


def _qr_single_kernel(x_ref, iota_ref, t1_ref, o_ref, *, num_embeddings):
    # num_embeddings == num_buckets path.  Matches the PyTorch module exactly:
    # plain lookup of (x % num_embeddings), intentionally WITHOUT the padding
    # mask or the +1 shift (the module returns self.embedding(x) directly here).
    x = x_ref[...] % num_embeddings
    onehot = (iota_ref[...] == x).astype(jnp.float32)
    o_ref[...] = jnp.dot(t1_ref[...], onehot, preferred_element_type=jnp.float32)


# ---------------------------------------------------------------------------
# Wrapper
# ---------------------------------------------------------------------------
def _pick_token_tile(n, block_tokens):
    n_ceil = pl.cdiv(n, 128) * 128
    tn = max(128, (min(int(block_tokens), n_ceil) // 128) * 128)
    # If everything fits in a single tile, split into (at least) two so v7x's
    # second TensorCore gets work along the "parallel" token axis.
    if n_ceil <= tn and n_ceil >= 256:
        tn = max(128, pl.cdiv(n_ceil // 2, 128) * 128)
    return tn


def qr_embedding_forward(x, table1, table2=None, *, num_embeddings, num_buckets,
                         combiner='mul', block_tokens=8192,
                         lane_major_output=False):
    """Pallas implementation of QREmbedding.forward."""
    b, s = x.shape
    n = b * s
    v1, d = table1.shape

    tn = _pick_token_tile(n, block_tokens)
    n_pad = pl.cdiv(n, tn) * tn
    grid = (n_pad // tn,)

    # Ids as a lane-dense (1, n_pad) row; pad ids are 0 -> they gather the
    # tables' padding rows, and those columns are sliced off below (consumers of
    # the raw lane-major output must ignore columns >= n).
    x_flat = jnp.pad(x.reshape(1, n).astype(jnp.int32), ((0, 0), (0, n_pad - n)))

    # Tables are pre-transposed (tiny, once per call) so the in-kernel gather
    # produces a lane-dense (out_d, TN) tile (unmasked vst's).
    t1t = table1.T                                           # (D, V1)

    if num_embeddings == num_buckets:
        out_d = d
        fused = t1t
        v_total = v1
        kernel = functools.partial(_qr_single_kernel, num_embeddings=num_embeddings)
    else:
        v2, _ = table2.shape
        t2t = table2.T                                       # (D, V2)
        v_total = v1 + v2
        # Invariants required by the OR-based one-hot (two hits per column):
        #   x_rem <= num_buckets   < v1
        #   x_quo <= num_quotients < v2   (so v1 + x_quo < v1 + v2)
        assert v1 >= num_buckets + 1
        assert v2 >= -(-num_embeddings // num_buckets) + 1
        if combiner == 'sum':
            out_d = d
            fused = jnp.concatenate([t1t, t2t], axis=1)      # (D, V1+V2)
            mul_combine = False
        elif combiner in ('mul', 'concat'):
            # Block-diagonal table: one matmul yields both embeddings stacked.
            top = jnp.concatenate([t1t, jnp.zeros((d, v2), t1t.dtype)], axis=1)
            bot = jnp.concatenate([jnp.zeros((d, v1), t2t.dtype), t2t], axis=1)
            fused = jnp.concatenate([top, bot], axis=0)      # (2D, V1+V2)
            mul_combine = (combiner == 'mul')
            out_d = d if mul_combine else 2 * d
        else:
            raise ValueError(combiner)
        kernel = functools.partial(_qr_fused_kernel,
                                   num_embeddings=num_embeddings,
                                   num_buckets=num_buckets,
                                   v1=v1, mul_combine=mul_combine)

    # Row-index column, VMEM-resident across the whole grid (no per-step iota).
    iota_col = jnp.arange(v_total, dtype=jnp.int32).reshape(v_total, 1)

    in_specs = [
        pl.BlockSpec((1, tn), lambda i: (0, i)),             # ids: token-tiled
        pl.BlockSpec(iota_col.shape, lambda i: (0, 0)),      # iota: resident
        pl.BlockSpec(fused.shape, lambda i: (0, 0)),         # table: resident
    ]

    cost = pl.CostEstimate(
        flops=2 * n_pad * int(fused.shape[0]) * v_total,
        transcendentals=0,
        bytes_accessed=4 * (n_pad + int(fused.size) + v_total + n_pad * out_d),
    )

    out_t = pl.pallas_call(
        kernel,
        out_shape=jax.ShapeDtypeStruct((out_d, n_pad), jnp.float32),
        grid=grid,
        in_specs=in_specs,
        out_specs=pl.BlockSpec((out_d, tn), lambda i: (0, i)),
        compiler_params=pltpu.CompilerParams(
            dimension_semantics=("parallel",)),
        cost_estimate=cost,
    )(x_flat, iota_col, fused)

    if lane_major_output:
        # Callers that can absorb the (out_d, N) layout (e.g. as the K-major
        # operand of a following matmul) skip the extra HBM transpose pass.
        return out_t[:, :n]
    # Layout plumbing back to (B, S, out_d): one extra XLA transpose pass.
    return out_t.T[:n].reshape(b, s, out_d)


# ---------------------------------------------------------------------------
# Pure-JAX reference (mirrors the PyTorch module)
# ---------------------------------------------------------------------------
def qr_embedding_reference(x, table1, table2, *, num_embeddings, num_buckets,
                           combiner='mul'):
    mask = (x != 0).astype(x.dtype)
    xm = x % num_embeddings
    x_rem = (xm % num_buckets + 1) * mask
    x_quo = (xm // num_buckets + 1) * mask
    embs = jnp.take(table1, x_rem, axis=0)
    embs2 = jnp.take(table2, x_quo, axis=0)
    if combiner == 'mul':
        return embs * embs2
    elif combiner == 'sum':
        return embs + embs2
    elif combiner == 'concat':
        return jnp.concatenate([embs, embs2], axis=-1)
    raise ValueError(combiner)


# TODO(synk): large_emb=True (lele.layers.LargeEmbedding) has no in-script
# equivalent; only the standard two-table QR forward path is implemented.

if __name__ == "__main__":
    # Module configuration (synthetic, deterministic).
    num_embeddings = 1000
    num_buckets = 32
    num_quotients = -(-num_embeddings // num_buckets)   # ceil div == 32
    embedding_dim = 32

    key = jax.random.PRNGKey(0)
    k_tab1, k_tab2, k_ids, k_ids2 = jax.random.split(key, 4)

    # nn.Embedding default init: N(0, 1).
    table1 = jax.random.normal(k_tab1, (num_buckets + 1, embedding_dim),
                               dtype=jnp.float32)
    table2 = jax.random.normal(k_tab2, (num_quotients + 1, embedding_dim),
                               dtype=jnp.float32)

    # Small shape (module-typical): batch=2, seq=8; zeros exercise the padding mask.
    B, S = 2, 8
    x_small = jax.random.randint(k_ids, (B, S), 0, 5 * num_embeddings,
                                 dtype=jnp.int32)
    x_small = x_small.at[0, 0].set(0).at[1, 3].set(0)

    # Medium shape to exercise the multi-tile (>= 2 grid steps) path.
    B2, S2 = 8, 512
    x_med = jax.random.randint(k_ids2, (B2, S2), 0, 5 * num_embeddings,
                               dtype=jnp.int32)
    x_med = x_med.at[0, 0].set(0)

    for x in (x_small, x_med):
        for combiner in ('mul', 'sum', 'concat'):
            out = qr_embedding_forward(
                x, table1, table2,
                num_embeddings=num_embeddings, num_buckets=num_buckets,
                combiner=combiner)
            out = jax.block_until_ready(out)

            ref = qr_embedding_reference(
                x, table1, table2,
                num_embeddings=num_embeddings, num_buckets=num_buckets,
                combiner=combiner)

            np.testing.assert_allclose(np.asarray(out), np.asarray(ref),
                                       rtol=1e-5, atol=1e-5)

    print("KERNEL_OK")
</pallas_src>

<mosaic_0001>
module attributes {stable_mosaic.version = 11 : i64} {
  func.func @_qr_fused_kernel(%arg0: i32, %arg1: memref<1x128xi32, #tpu.memory_space<vmem>>, %arg2: memref<66x1xi32, #tpu.memory_space<vmem>>, %arg3: memref<64x66xf32, #tpu.memory_space<vmem>>, %arg4: memref<32x128xf32, #tpu.memory_space<vmem>>) attributes {dimension_semantics = [#tpu.dimension_semantics<parallel>], iteration_bounds = array<i64: 1>, scalar_prefetch = 0 : i64, scratch_operands = 0 : i64, tpu.core_type = #tpu.core_type<tc>, window_params = [{transform_indices = @transform_0, window_bounds = array<i64: 1, 128>}, {pipeline_mode = #tpu.pipeline_mode<synchronous>, transform_indices = @transform_1, window_bounds = array<i64: 66, 1>}, {pipeline_mode = #tpu.pipeline_mode<synchronous>, transform_indices = @transform_2, window_bounds = array<i64: 64, 66>}, {transform_indices = @transform_3, window_bounds = array<i64: 32, 128>}]} {
    %c0 = arith.constant 0 : index
    %c0_0 = arith.constant 0 : index
    %0 = vector.load %arg1[%c0, %c0_0] : memref<1x128xi32, #tpu.memory_space<vmem>>, vector<1x128xi32>
    %c0_i32 = arith.constant 0 : i32
    %1 = vector.broadcast %c0_i32 : i32 to vector<1x128xi32>
    %2 = arith.cmpi ne, %0, %1 : vector<1x128xi32>
    %3 = arith.extui %2 : vector<1x128xi1> to vector<1x128xi32>
    %c1000_i32 = arith.constant 1000 : i32
    %c0_i32_1 = arith.constant 0 : i32
    %4 = arith.cmpi eq, %c1000_i32, %c0_i32_1 : i32
    %c1_i32 = arith.constant 1 : i32
    %5 = arith.select %4, %c1_i32, %c1000_i32 : i32
    %6 = vector.broadcast %5 : i32 to vector<1x128xi32>
    %7 = arith.remsi %0, %6 : vector<1x128xi32>
    %c0_i32_2 = arith.constant 0 : i32
    %8 = vector.broadcast %c0_i32_2 : i32 to vector<1x128xi32>
    %9 = arith.cmpi ne, %7, %8 : vector<1x128xi32>
    %c0_i32_3 = arith.constant 0 : i32
    %10 = vector.broadcast %c0_i32_3 : i32 to vector<1x128xi32>
    %11 = arith.cmpi slt, %7, %10 : vector<1x128xi32>
    %c0_i32_4 = arith.constant 0 : i32
    %12 = arith.cmpi slt, %5, %c0_i32_4 : i32
    %13 = vector.broadcast %12 : i1 to vector<1x128xi1>
    %14 = vector.broadcast %13 : vector<1x128xi1> to vector<1x128xi1>
    %15 = arith.xori %11, %14 : vector<1x128xi1>
    %16 = arith.andi %15, %9 : vector<1x128xi1>
    %17 = vector.broadcast %5 : i32 to vector<1x128xi32>
    %18 = arith.addi %7, %17 : vector<1x128xi32>
    %19 = arith.select %16, %18, %7 : vector<1x128xi1>, vector<1x128xi32>
    %c31_i32 = arith.constant 31 : i32
    %20 = vector.broadcast %c31_i32 : i32 to vector<1x128xi32>
    %21 = arith.andi %19, %20 : vector<1x128xi32>
    %c5_i32 = arith.constant 5 : i32
    %22 = vector.broadcast %c5_i32 : i32 to vector<1x128xi32>
    %23 = arith.shrsi %19, %22 : vector<1x128xi32>
    %c1_i32_5 = arith.constant 1 : i32
    %24 = vector.broadcast %c1_i32_5 : i32 to vector<1x128xi32>
    %25 = arith.addi %21, %24 : vector<1x128xi32>
    %26 = arith.muli %25, %3 : vector<1x128xi32>
    %c1_i32_6 = arith.constant 1 : i32
    %27 = vector.broadcast %c1_i32_6 : i32 to vector<1x128xi32>
    %28 = arith.addi %23, %27 : vector<1x128xi32>
    %29 = arith.muli %28, %3 : vector<1x128xi32>
    %c0_7 = arith.constant 0 : index
    %c0_8 = arith.constant 0 : index
    %30 = vector.load %arg2[%c0_7, %c0_8] : memref<66x1xi32, #tpu.memory_space<vmem>>, vector<66x1xi32>
    %31 = vector.broadcast %30 : vector<66x1xi32> to vector<66x128xi32>
    %32 = vector.broadcast %26 : vector<1x128xi32> to vector<66x128xi32>
    %33 = arith.cmpi eq, %31, %32 : vector<66x128xi32>
    %c33_i32 = arith.constant 33 : i32
    %34 = vector.broadcast %c33_i32 : i32 to vector<1x128xi32>
    %35 = arith.addi %29, %34 : vector<1x128xi32>
    %36 = vector.broadcast %30 : vector<66x1xi32> to vector<66x128xi32>
    %37 = vector.broadcast %35 : vector<1x128xi32> to vector<66x128xi32>
    %38 = arith.cmpi eq, %36, %37 : vector<66x128xi32>
    %39 = arith.ori %33, %38 : vector<66x128xi1>
    %40 = arith.extui %39 : vector<66x128xi1> to vector<66x128xi32>
    %41 = arith.sitofp %40 : vector<66x128xi32> to vector<66x128xf32>
    %c0_9 = arith.constant 0 : index
    %c0_10 = arith.constant 0 : index
    %42 = vector.load %arg3[%c0_9, %c0_10] : memref<64x66xf32, #tpu.memory_space<vmem>>, vector<64x66xf32>
    %cst = arith.constant dense<0.000000e+00> : vector<64x128xf32>
    %43 = tpu.matmul %42, %41, %cst {dimension_numbers = #tpu.dot_dimension_numbers<[1], [0], [0], [1], [0, 0, 1, 1], [], []>} : vector<64x66xf32>, vector<66x128xf32>, vector<64x128xf32> -> vector<64x128xf32>
    %44 = vector.extract_strided_slice %43 {offsets = [0, 0], sizes = [32, 128], strides = [1, 1]} : vector<64x128xf32> to vector<32x128xf32>
    %45 = vector.extract_strided_slice %43 {offsets = [32, 0], sizes = [32, 128], strides = [1, 1]} : vector<64x128xf32> to vector<32x128xf32>
    %46 = arith.mulf %44, %45 : vector<32x128xf32>
    %c0_11 = arith.constant 0 : index
    %c0_12 = arith.constant 0 : index
    %47 = vector.load %arg4[%c0_11, %c0_12] : memref<32x128xf32, #tpu.memory_space<vmem>>, vector<32x128xf32>
    tpu.vector_store %arg4[%c0_11, %c0_12], %46 {strides = array<i32>} : memref<32x128xf32, #tpu.memory_space<vmem>>, vector<32x128xf32>,
    return
  }
  func.func @transform_0(%arg0: i32) -> (i32, i32) {
    %c0_i32 = arith.constant 0 : i32
    %c0_i32_0 = arith.constant 0 : i32
    return %c0_i32, %arg0 : i32, i32
  }
  func.func @transform_1(%arg0: i32) -> (i32, i32) {
    %c0_i32 = arith.constant 0 : i32
    %c0_i32_0 = arith.constant 0 : i32
    %c0_i32_1 = arith.constant 0 : i32
    return %c0_i32, %c0_i32_0 : i32, i32
  }
  func.func @transform_2(%arg0: i32) -> (i32, i32) {
    %c0_i32 = arith.constant 0 : i32
    %c0_i32_0 = arith.constant 0 : i32
    %c0_i32_1 = arith.constant 0 : i32
    return %c0_i32, %c0_i32_0 : i32, i32
  }
  func.func @transform_3(%arg0: i32) -> (i32, i32) {
    %c0_i32 = arith.constant 0 : i32
    %c0_i32_0 = arith.constant 0 : i32
    return %c0_i32, %arg0 : i32, i32
  }
}

</mosaic_0001>

<bundles_post_ra>
// kernel: tpu_custom_call.1
= control target key start
LH: loop header
LB: loop body
LE: loop exit
PB: predicated region body
PF: predicated region fallthrough
CT: control target
= control target key end

     0   :  { %v430_v2 = vmov 0   ;;  %s552_s0 = inlined_call_operand.vmem [shape: s32[1,128], index: 0, kind: input, shape index: {}]   ;;  %s553_s1 = inlined_call_operand.vmem [shape: s32[66,1], index: 1, kind: input, shape index: {}]   ;;  %s554_s2 = inlined_call_operand.vmem [shape: f32[64,66], index: 2, kind: input, shape index: {}]   ;;  %s555_s3 = inlined_call_operand.hbm [shape: f32[32,128], index: 3, kind: output, shape index: {}]  }
   0x1   :  { %v42_v0 = vld [vmem:[%s553_s1 + $0x10] sm:$0xff]  ;;  %v40_v1 = vld [vmem:[%s553_s1] sm:$0xff]  ;;  %405 = vset.pattern.permute.xlu1 %v430_v2  ;;  %404 = vset.pattern.permute.xlu0 %v430_v2  ;;  %v43_v3 = vld [vmem:[%s553_s1 + $0x18] sm:$0xff] }
   0x2   :  { %56 = vperm.xlu1 %405, %v42_v0   ;;  %50 = vperm.xlu0 %404, %v40_v1   ;;  %v41_v4 = vld [vmem:[%s553_s1 + $0x8] sm:$0xff] }
   0x3   :  { %8 = vsyncpa [#allocation3], 0  ;;  %v45_v5 = vld [vmem:[%s553_s1 + $0x28] sm:$0xff]  ;;  %v44_v6 = vld [vmem:[%s553_s1 + $0x20] sm:$0xff]  ;;  %vm556_vm0 = vcmask 539648   ;;  %v76_v25 = vlaneseq  ;;  %v432_v49 = vmov 0.0  }
   0x4   :  { %v47_v7 = vld [vmem:[%s553_s1 + $0x38] sm:$0xff]  ;;  %v46_v8 = vld [vmem:[%s553_s1 + $0x30] sm:$0xff]  ;;  %v48_v9 = vld [vmem:[%s553_s1 + $0x40] sm:$0x3]  ;;  %v431_v44 = vmov 1.0|1.0  }
   0x5   :  { %v130_v10 = vld [vmem:[%s554_s2] sm:$0xff]  ;;  %v77_v29 = vshrl.u32 %v76_v25, 7  ;;  %v131_v51 = vld [vmem:[%s554_s2 + $0x8] sm:$0xff]  ;;  %v132_v53 = vld [vmem:[%s554_s2 + $0x10] sm:$0xff]  ;;  %s433_s19 = smov [#allocation2]  }
   0x6   :  { %59 = vperm.xlu1 %405, %v43_v3   ;;  %53 = vperm.xlu0 %404, %v41_v4   ;;  %v134_v11 = vld [vmem:[%s554_s2 + $0x20] sm:$0xff]  ;;  %v135_v52 = vld [vmem:[%s554_s2 + $0x28] sm:$0xff]  ;;  %v136_v54 = vld [vmem:[%s554_s2 + $0x30] sm:$0xff]  ;;  %s285_s20 = sshll.u32 %s433_s19, 4  ;;  %s286_s20 = int_to_ptr.vmem [resolvable:$true] %s285_s20 }
   0x7   :  { %358 = vmatprep.mubr.msk.f32.mxu0 %vm556_vm0, %v130_v10  ;;  %364 = vmatprep.mubr.msk.f32.mxu1 %vm556_vm0, %v134_v11  ;;  %v15_v12 = vld [vmem:[%s552_s0] sm:$0x1]  ;;  %v78_v32 = vsub.s32 0, %v77_v29  ;;  %v133_v55 = vld [vmem:[%s554_s2 + $0x18] sm:$0xff]  ;;  %p411_p1 = scmp.lt.s32.totalorder %s286_s20, %s286_s20 }
   0x8   :  { %v19_v13 = vsub.s32 0, %v15_v12  ;;  %vm18_vm1 = vcmp.lt.s32.totalorder %v15_v12, 0  ;;  %vm16_vm5 = vcmp.ne.s32.totalorder %v15_v12, 0  ;;  %v137_v56 = vld [vmem:[%s554_s2 + $0x38] sm:$0xff]  ;;  %s406_s2 = scalar_lea.vmem %s286_s20, 512 }
   0x9   :  { %v17_v28 = vsel %vm16_vm5, 1, %v430_v2  ;;  %p407_p0 = scmp.ne.s32.totalorder %s286_s20, %s406_s2  ;;  %p412_p2 = scmp.lt.s32.totalorder %s406_s2, %s406_s2 }
   0xa   :  { %65 = vperm.xlu1 %405, %v45_v5   ;;  %62 = vperm.xlu0 %404, %v44_v6   ;;  %v296_v14 = vmin.u32 %v19_v13, %v15_v12 }
   0xb   :  { %p413_p3 = por %p412_p2, %p411_p1 }
   0xc   :  { %v494_v15 = vmul.u32.u64.low 2199023256, %v296_v14  ;;  %v495_v16 = vmul.u32.u64.high 2199023256, %v296_v14, %v494_v15 }
   0xd   :  { %p414_p4 = pnand %p413_p3, %p407_p0 }
   0xe   :  { %71 = vperm.xlu1 %405, %v47_v7   ;;  %68 = vperm.xlu0 %404, %v46_v8   ;;  %v24_v17 = vshrl.u32 %v495_v16, 9 }
  0x10   :  { %v25_v18 = vmul.u32 1000, %v24_v17 }
  0x12   :  { %74 = vperm.xlu0 %404, %v48_v9   ;;  %v26_v19 = vsub.s32 %v296_v14, %v25_v18 }
  0x14   :  { %v27_v20 = vsub.s32 0, %v26_v19 }
  0x16   :  { %v28_v21 = vsel %vm18_vm1, %v27_v20, %v26_v19 }
  0x17   :  { %vm29_vm2 = vcmp.ne.s32.totalorder %v28_v21, 0  ;;  %vm30_vm3 = vcmp.lt.s32.totalorder %v28_v21, 0  ;;  %v32_v22 = vadd.s32 1000, %v28_v21 }
  0x18   :  { %vm31_vm4 = vmand %vm30_vm3, %vm29_vm2 }
  0x19   :  { %v33_v23 = vsel %vm31_vm4, %v32_v22, %v28_v21 }
  0x1a   :  { %v35_v24 = vshra.s32 %v33_v23, 5  ;;  %v34_v26 = vand.u32 31, %v33_v23 }
  0x1c   :  { %v38_v27 = vadd.s32 1, %v35_v24  ;;  %v36_v30 = vadd.s32 1, %v34_v26 }
  0x1e   :  { %v39_v31 = vmul.u32 %v38_v27, %v17_v28  ;;  %v37_v33 = vmul.u32 %v36_v30, %v17_v28 }
  0x20   :  { %v89_v34 = vadd.s32 33, %v39_v31  ;;  %v79_v35 = vrot.slane %v37_v33, %v78_v32 }
  0x22   :  { %v93_v36 = vrot.slane %v89_v34, %v78_v32 }
  0x81   :  { %v57_v37 = vpop.permute.xlu1 %56  ;;  %v51_v38 = vpop.permute.xlu0 %50 }
  0x82   :  { %vm82_vm6 = vcmp.eq.s32.totalorder %v57_v37, %v79_v35  ;;  %vm96_vm7 = vcmp.eq.s32.totalorder %v57_v37, %v93_v36  ;;  %vm80_vm8 = vcmp.eq.s32.totalorder %v51_v38, %v79_v35  ;;  %vm94_vm9 = vcmp.eq.s32.totalorder %v51_v38, %v93_v36 }
  0x83   :  { %vm498_vm10 = vmor %vm82_vm6, %vm96_vm7 }
  0x84   :  { %vm103_vm11 = vmor %vm80_vm8, %vm94_vm9 }
  0x85   :  { %v60_v40 = vpop.permute.xlu1 %59  ;;  %v54_v41 = vpop.permute.xlu0 %53 }
  0x86   :  { %vm83_vm12 = vcmp.eq.s32.totalorder %v60_v40, %v79_v35  ;;  %vm97_vm13 = vcmp.eq.s32.totalorder %v60_v40, %v93_v36  ;;  %vm81_vm14 = vcmp.eq.s32.totalorder %v54_v41, %v79_v35  ;;  %vm95_vm15 = vcmp.eq.s32.totalorder %v54_v41, %v93_v36 }
  0x87   :  { %vm106_vm1 = vmor %vm83_vm12, %vm97_vm13 }
  0x88   :  { %vm104_vm2 = vmor %vm81_vm14, %vm95_vm15 }
  0x89   :  { %v66_v42 = vpop.permute.xlu1 %65  ;;  %v63_v43 = vpop.permute.xlu0 %62  ;;  %vm370_vm3 = vmpackc.low %vm104_vm2, %vm103_vm11 }
  0x8a   :  { %vm85_vm4 = vcmp.eq.s32.totalorder %v66_v42, %v79_v35  ;;  %vm99_vm5 = vcmp.eq.s32.totalorder %v66_v42, %v93_v36  ;;  %vm84_vm0 = vcmp.eq.s32.totalorder %v63_v43, %v79_v35  ;;  %vm98_vm6 = vcmp.eq.s32.totalorder %v63_v43, %v93_v36  ;;  %371 = vmatprep.subr.msk.bf16.mxu0 %vm370_vm3, %v431_v44  ;;  %vm504_vm7 = vmpackc.low %vm106_vm1, %vm498_vm10 }
  0x8b   :  { %vm108_vm8 = vmor %vm85_vm4, %vm99_vm5  ;;  %386 = vmatprep.subr.msk.bf16.mxu1 %vm370_vm3, %v431_v44  ;;  %373 = vmatpush3.bf16.msk.msra.mxu0 %vm370_vm3, %v431_v44  ;;  %vm163_vm5 = vcmask 1041408  }
  0x8c   :  { %vm107_vm9 = vmor %vm84_vm0, %vm98_vm6  ;;  %391 = vmatpush3.bf16.msk.msra.mxu1 %vm370_vm3, %v431_v44  ;;  %375 = vmatprep.subr.msk.bf16.mxu0 %vm504_vm7, %v431_v44  ;;  %vm561_vm6 = vcmask 539648  }
  0x8d   :  { %387 = vmatprep.subr.msk.bf16.mxu1 %vm504_vm7, %v431_v44  ;;  %v72_v46 = vpop.permute.xlu1 %71  ;;  %v69_v47 = vpop.permute.xlu0 %68  ;;  %vm378_vm14 = vmpackc.low %vm108_vm8, %vm107_vm9 }
  0x8e   :  { %vm87_vm11 = vcmp.eq.s32.totalorder %v72_v46, %v79_v35  ;;  %vm101_vm12 = vcmp.eq.s32.totalorder %v72_v46, %v93_v36  ;;  %vm86_vm13 = vcmp.eq.s32.totalorder %v69_v47, %v79_v35  ;;  %vm100_vm10 = vcmp.eq.s32.totalorder %v69_v47, %v93_v36  ;;  %vm563_vm8 = vmmov %vm561_vm6 }
  0x8f   :  { %vm110_vm15 = vmor %vm87_vm11, %vm101_vm12  ;;  %377 = vmatpush3.bf16.msk.msra.mxu0 %vm504_vm7, %v431_v44 }
  0x90   :  { %vm109_vm1 = vmor %vm86_vm13, %vm100_vm10  ;;  %392 = vmatpush3.bf16.msk.msra.mxu1 %vm504_vm7, %v431_v44  ;;  %379 = vmatprep.subr.msk.bf16.mxu0 %vm378_vm14, %v431_v44 }
  0x91   :  { %388 = vmatprep.subr.msk.bf16.mxu1 %vm378_vm14, %v431_v44  ;;  %v75_v48 = vpop.permute.xlu0 %74  ;;  %vm382_vm3 = vmpackc.low %vm110_vm15, %vm109_vm1 }
  0x92   :  { %vm88_vm0 = vcmp.eq.s32.totalorder %v75_v48, %v79_v35  ;;  %vm102_vm2 = vcmp.eq.s32.totalorder %v75_v48, %v93_v36  ;;  %vm562_vm7 = vmmov %vm561_vm6 }
  0x93   :  { %381 = vmatpush3.bf16.msk.msra.mxu0 %vm378_vm14, %v431_v44  ;;  %vm111_vm4 = vmor %vm88_vm0, %vm102_vm2 }
  0x94   :  { %393 = vmatpush3.bf16.msk.msra.mxu1 %vm378_vm14, %v431_v44  ;;  %383 = vmatprep.subr.msk.bf16.mxu0 %vm382_vm3, %v431_v44  ;;  %v305_v50 = vsel %vm111_vm4, 1.0, %v432_v49  ;;  %vm564_vm9 = vmmov %vm561_vm6 }
  0x95   :  { %389 = vmatprep.subr.msk.bf16.mxu1 %vm382_vm3, %v431_v44  ;;  %vm565_vm11 = vmmov %vm561_vm6 }
  0x96   :  { %vm566_vm12 = vmmov %vm561_vm6 }
  0x97   :  { %385 = vmatpush3.bf16.msk.msra.mxu0 %vm382_vm3, %v431_v44 }
  0x98   :  { %394 = vmatpush3.bf16.msk.msra.mxu1 %vm382_vm3, %v431_v44  ;;  %356 = vmatprep.subr.msk.mxu0 %vm163_vm5, %v305_v50 }
  0x99   :  { %390 = vmatprep.subr.msk.mxu1 %vm163_vm5, %v305_v50 }
  0x9b   :  { %357 = vmatpush3.msk.msra.mxu0 %vm163_vm5, %v305_v50 }
  0x9c   :  { %395 = vmatpush3.msk.msra.mxu1 %vm163_vm5, %v305_v50  ;;  %359 = vmatmul.mubr.msk.f32.vlgmr.msra.gmra.mrb[0].mxu0 %vm561_vm6, %v131_v51 }
  0x9d   :  { %365 = vmatmul.mubr.msk.f32.vlgmr.msra.gmra.mrb[0].mxu1 %vm562_vm7, %v135_v52  ;;  %361 = vmatprep.mubr.msk.f32.mxu0 %vm563_vm8, %v132_v53 }
  0x9e   :  { %367 = vmatprep.mubr.msk.f32.mxu1 %vm564_vm9, %v136_v54 }
  0xa0   :  { %362 = vmatmul.mubr.msk.f32.gmra.mrb[2].mxu0 %vm565_vm11, %v133_v55 }
  0xa1   :  { %368 = vmatmul.mubr.msk.f32.gmra.mrb[2].mxu1 %vm566_vm12, %v137_v56 }
 0x16f   :  { %v360_v57 = vpop.f32.mrb[0].mxu0 }
 0x170   :  { %v366_v58 = vpop.f32.mrb[0].mxu1  ;;  %v233_v59 = vpop.f32.mrb[1].mxu0 }
 0x171   :  { %v273_v60 = vmul.f32 %v366_v58, %v360_v57  ;;  %v253_v61 = vpop.f32.mrb[1].mxu1 }
 0x172   :  { %v272_v62 = vmul.f32 %v253_v61, %v233_v59 }
 0x173   :  { %277 = vst [vmem:[#allocation2 + $0x8] sm:$0xff] %v273_v60  ;;  %v363_v63 = vpop.f32.mrb[2].mxu0 }
 0x174   :  { %276 = vst [vmem:[#allocation2] sm:$0xff] %v272_v62  ;;  %v369_v0 = vpop.f32.mrb[2].mxu1  ;;  %v243_v1 = vpop.f32.mrb[3].mxu0 }
 0x175   :  { %v275_v2 = vmul.f32 %v369_v0, %v363_v63  ;;  %v263_v3 = vpop.f32.mrb[3].mxu1 }
 0x176   :  { %v274_v4 = vmul.f32 %v263_v3, %v243_v1 }
 0x177   :  { %279 = vst [vmem:[#allocation2 + $0x18] sm:$0xff] %v275_v2 }
 0x178   :  { %278 = vst [vmem:[#allocation2 + $0x10] sm:$0xff] %v274_v4 }
 0x179   :  { %417 = shalt.err (!%p414_p4)
}
 0x17a   :  { %s418_s23 = scalar_lea.hbm %s555_s3, 512 }
 0x17b   :  { %p419_p5 = scmp.ne.s32.totalorder %s555_s3, %s418_s23  ;;  %p422_p6 = scmp.lt.u32.totalorder %s418_s23, %s555_s3 }
 0x17d   :  { %p424_p7 = pnand %p422_p6, %p419_p5 }
 0x17f   :  { %427 = shalt.err (!%p424_p7)
}
 0x180   :  { %s434_s28 = smov 128   ;;  %s435_s29 = smov 8  }
 0x181   :  { %291 = dma.vmem_to_hbm [thread:$0]  %s286_s20, 512, %s555_s3, [#allocation3], %s434_s28, %s434_s28, %s435_s29  }
 0x182   :  { %428 = dma.done.wait [#allocation3], 512  }
 0x183   :  { %429 = vsyncadd [#allocation3], 4294966784 }
 0x184   :  { %295 = vsyncpa [#allocation3], 1 }

</bundles_post_ra>
